<compile_context>
chip_gen: v6e
topology: v6e:2x2x1
jax: 0.10.0
libtpu: 0.0.40
codegen_flags: <defaults>
</compile_context>

<pallas_src>
import jax
import jax.numpy as jnp
from jax.experimental import pallas as pl
from jax.experimental.pallas import tpu as pltpu


def mlp_kernel(x_ref, w1_ref, b1_ref, w2_ref, b2_ref,
               w3_ref, b3_ref, w4_ref, b4_ref, o_ref):
    dt = w2_ref.dtype            # MXU operand dtype (f32, or bf16 on v6e/v7x)
    x = x_ref[...]               # (1, T): batch on lanes

    # Layer 1 (in_dim == 1): degenerate K=1 contraction done on the VPU as a
    # broadcast outer product. x is pre-cast to the weight dtype in the
    # wrapper, so with bf16 weights this runs on the bf16 VALU and h lands
    # directly in the MXU dtype (the astype is then a no-op).
    h = jnp.maximum(w1_ref[...] * x + b1_ref[...], 0.0).astype(dt)    # (H, T)

    # Layers 2 & 3: dense 128x128 matmuls on the MXU, f32 accumulation,
    # batch stays on lanes so every activation block is lane-dense.
    h = jnp.dot(w2_ref[...], h, preferred_element_type=jnp.float32)
    h = jnp.maximum(h + b2_ref[...], 0.0).astype(dt)
    h = jnp.dot(w3_ref[...], h, preferred_element_type=jnp.float32)
    h = jnp.maximum(h + b3_ref[...], 0.0).astype(dt)

    # Output layer (out_dim == 1): degenerate M=1 matmul kept on the (idle)
    # MXU instead of a VPU multiply + XLU sublane reduce; the binding unit at
    # steady state is the VPU, so this is essentially free MXU slack.
    y = jnp.dot(w4_ref[...], h, preferred_element_type=jnp.float32)   # (1, T)
    o_ref[...] = (y + b4_ref[...]).astype(o_ref.dtype)


def prepare_params(params):
    """One-time conversion of PyTorch-convention params (W: (out,in), b: (out,))
    into the kernel layout. Call once at init so no reshapes/transposes sit on
    the per-call forward path."""
    return (
        params["w1"],                     # (H, 1)
        params["b1"].reshape(-1, 1),      # (H, 1)
        params["w2"],                     # (H, H)
        params["b2"].reshape(-1, 1),      # (H, 1)
        params["w3"],                     # (H, H)
        params["b3"].reshape(-1, 1),      # (H, 1)
        params["w4"],                     # (1, H): already the MXU row layout
        params["b4"].reshape(1, 1),       # (1, 1)
    )


def policy_network_forward(x, prepped, *, batch_tile=2048, x_dtype=None):
    """Fused forward pass of PolicyNetwork.

    x: (B, 1) float32. prepped: output of prepare_params (f32 or bf16 weights;
    bf16 recommended on v6e/v7x, accumulation stays f32).
    batch_tile: lanes per grid step (multiple of 128). 2048 amortizes the
    ~600-cycle per-step pipeline overhead; for large B prefer a tile giving
    >= 4 grid steps (and an even count on v7x so both TensorCores get >= 2
    pipelined steps via the "parallel" batch axis).
    x_dtype: dtype of x / layer-1 elementwise math. Default = weight dtype
    (best on v6e/v7x bf16 VALUs); pass jnp.float32 on v5e with bf16 weights.
    """
    B, in_dim = x.shape
    assert in_dim == 1, "PolicyNetwork takes a single scalar feature"
    assert batch_tile % 128 == 0, "batch_tile must be a multiple of 128"

    w1, b1, w2, b2, w3, b3, w4, b4 = prepped
    H = w2.shape[0]
    if x_dtype is None:
        x_dtype = w2.dtype

    # Tile = min(batch_tile, padded batch); pad only when actually needed.
    tile = min(batch_tile, pl.cdiv(B, 128) * 128)
    Bp = pl.cdiv(B, tile) * tile
    xr = x[:, 0].astype(x_dtype)
    if Bp != B:
        xr = jnp.pad(xr, (0, Bp - B))
    xr = xr.reshape(1, Bp)

    grid = (Bp // tile,)

    def rep(arr):
        # Constant index_map: weights/biases stay VMEM-resident; Pallas skips
        # the re-DMA when the block index does not change between grid steps.
        return pl.BlockSpec(arr.shape, lambda i: (0, 0))

    compiler_kwargs = dict(dimension_semantics=("parallel",))
    # v5e's scoped-VMEM default is 16 MiB; only very large tiles need a bump.
    vmem_est = 3 * H * tile * 4 + 4 * tile * 4 + 512 * 1024
    if vmem_est > 12 * 1024 * 1024:
        compiler_kwargs["vmem_limit_bytes"] = min(2 * vmem_est, 64 * 1024 * 1024)

    out = pl.pallas_call(
        mlp_kernel,
        out_shape=jax.ShapeDtypeStruct((1, Bp), jnp.float32),
        grid=grid,
        in_specs=[
            pl.BlockSpec((1, tile), lambda i: (0, i)),   # x (lane-dense)
            rep(w1), rep(b1),
            rep(w2), rep(b2),
            rep(w3), rep(b3),
            rep(w4), rep(b4),
        ],
        out_specs=pl.BlockSpec((1, tile), lambda i: (0, i)),
        compiler_params=pltpu.CompilerParams(**compiler_kwargs),
    )(xr, w1, b1, w2, b2, w3, b3, w4, b4)

    return out[0, :B].reshape(B, 1)


def init_params(key, input_dim=1, hidden_dims=(128, 128, 128), output_dim=1):
    """PyTorch-style init: W,b ~ U(-1/sqrt(fan_in), 1/sqrt(fan_in)),
    weights stored as (out_features, in_features), biases as (out_features,)."""
    dims = [input_dim] + list(hidden_dims) + [output_dim]
    params = {}
    keys = jax.random.split(key, 2 * (len(dims) - 1))
    for i in range(len(dims) - 1):
        bound = float(dims[i]) ** -0.5
        params[f"w{i + 1}"] = jax.random.uniform(
            keys[2 * i], (dims[i + 1], dims[i]), jnp.float32, -bound, bound)
        params[f"b{i + 1}"] = jax.random.uniform(
            keys[2 * i + 1], (dims[i + 1],), jnp.float32, -bound, bound)
    return params


def reference_forward(x, params):
    hp = jax.lax.Precision.HIGHEST
    h = x
    for i in range(1, 4):
        h = jnp.maximum(
            jnp.dot(h, params[f"w{i}"].T, precision=hp) + params[f"b{i}"], 0.0)
    return jnp.dot(h, params["w4"].T, precision=hp) + params["b4"]


if __name__ == "__main__":
    key = jax.random.PRNGKey(0)
    pkey, xkey = jax.random.split(key)

    params = init_params(pkey, input_dim=1, hidden_dims=(128, 128, 128),
                         output_dim=1)
    prepped = prepare_params(params)

    # Small demo batch of stock prices S; B=200 is deliberately NOT a multiple
    # of 128 so the pad + slice path is exercised (tile auto-shrinks to 256).
    B = 200
    x = jax.random.uniform(xkey, (B, 1), jnp.float32, 0.5, 1.5)
    ref = reference_forward(x, params)

    # float32 path.
    out = jax.block_until_ready(policy_network_forward(x, prepped))
    assert out.shape == (B, 1)
    assert jnp.allclose(out, ref, atol=5e-3, rtol=5e-3), "f32 mismatch"

    # bfloat16 weights path (v6e/v7x throughput lever): x is cast to bf16 in
    # the wrapper, layer-1 elementwise math runs in bf16, accumulation is f32.
    params_bf16 = {k: v.astype(jnp.bfloat16) for k, v in params.items()}
    prepped_bf16 = prepare_params(params_bf16)
    out_bf16 = jax.block_until_ready(policy_network_forward(x, prepped_bf16))
    assert out_bf16.shape == (B, 1)
    assert jnp.allclose(out_bf16, ref, atol=5e-2, rtol=1.5e-1), "bf16 mismatch"

    print("KERNEL_OK")
</pallas_src>

<mosaic_0001>
module attributes {stable_mosaic.version = 11 : i64} {
  func.func @mlp_kernel(%arg0: i32, %arg1: memref<1x256xf32, #tpu.memory_space<vmem>>, %arg2: memref<128x1xf32, #tpu.memory_space<vmem>>, %arg3: memref<128x1xf32, #tpu.memory_space<vmem>>, %arg4: memref<128x128xf32, #tpu.memory_space<vmem>>, %arg5: memref<128x1xf32, #tpu.memory_space<vmem>>, %arg6: memref<128x128xf32, #tpu.memory_space<vmem>>, %arg7: memref<128x1xf32, #tpu.memory_space<vmem>>, %arg8: memref<1x128xf32, #tpu.memory_space<vmem>>, %arg9: memref<1x1xf32, #tpu.memory_space<vmem>>, %arg10: memref<1x256xf32, #tpu.memory_space<vmem>>) attributes {dimension_semantics = [#tpu.dimension_semantics<parallel>], iteration_bounds = array<i64: 1>, scalar_prefetch = 0 : i64, scratch_operands = 0 : i64, tpu.core_type = #tpu.core_type<tc>, window_params = [{transform_indices = @transform_0, window_bounds = array<i64: 1, 256>}, {pipeline_mode = #tpu.pipeline_mode<synchronous>, transform_indices = @transform_1, window_bounds = array<i64: 128, 1>}, {pipeline_mode = #tpu.pipeline_mode<synchronous>, transform_indices = @transform_2, window_bounds = array<i64: 128, 1>}, {pipeline_mode = #tpu.pipeline_mode<synchronous>, transform_indices = @transform_3, window_bounds = array<i64: 128, 128>}, {pipeline_mode = #tpu.pipeline_mode<synchronous>, transform_indices = @transform_4, window_bounds = array<i64: 128, 1>}, {pipeline_mode = #tpu.pipeline_mode<synchronous>, transform_indices = @transform_5, window_bounds = array<i64: 128, 128>}, {pipeline_mode = #tpu.pipeline_mode<synchronous>, transform_indices = @transform_6, window_bounds = array<i64: 128, 1>}, {pipeline_mode = #tpu.pipeline_mode<synchronous>, transform_indices = @transform_7, window_bounds = array<i64: 1, 128>}, {pipeline_mode = #tpu.pipeline_mode<synchronous>, transform_indices = @transform_8, window_bounds = array<i64: 1, 1>}, {transform_indices = @transform_9, window_bounds = array<i64: 1, 256>}]} {
    %c0 = arith.constant 0 : index
    %c0_0 = arith.constant 0 : index
    %0 = vector.load %arg1[%c0, %c0_0] : memref<1x256xf32, #tpu.memory_space<vmem>>, vector<1x256xf32>
    %c0_1 = arith.constant 0 : index
    %c0_2 = arith.constant 0 : index
    %1 = vector.load %arg2[%c0_1, %c0_2] : memref<128x1xf32, #tpu.memory_space<vmem>>, vector<128x1xf32>
    %2 = vector.broadcast %1 : vector<128x1xf32> to vector<128x256xf32>
    %3 = vector.broadcast %0 : vector<1x256xf32> to vector<128x256xf32>
    %4 = arith.mulf %2, %3 : vector<128x256xf32>
    %c0_3 = arith.constant 0 : index
    %c0_4 = arith.constant 0 : index
    %5 = vector.load %arg3[%c0_3, %c0_4] : memref<128x1xf32, #tpu.memory_space<vmem>>, vector<128x1xf32>
    %6 = vector.broadcast %5 : vector<128x1xf32> to vector<128x256xf32>
    %7 = arith.addf %4, %6 : vector<128x256xf32>
    %cst = arith.constant 0.000000e+00 : f32
    %8 = vector.broadcast %cst : f32 to vector<128x256xf32>
    %9 = arith.maximumf %7, %8 : vector<128x256xf32>
    %c0_5 = arith.constant 0 : index
    %c0_6 = arith.constant 0 : index
    %10 = vector.load %arg4[%c0_5, %c0_6] : memref<128x128xf32, #tpu.memory_space<vmem>>, vector<128x128xf32>
    %cst_7 = arith.constant dense<0.000000e+00> : vector<128x256xf32>
    %11 = tpu.matmul %10, %9, %cst_7 {dimension_numbers = #tpu.dot_dimension_numbers<[1], [0], [0], [1], [0, 0, 1, 1], [], []>} : vector<128x128xf32>, vector<128x256xf32>, vector<128x256xf32> -> vector<128x256xf32>
    %c0_8 = arith.constant 0 : index
    %c0_9 = arith.constant 0 : index
    %12 = vector.load %arg5[%c0_8, %c0_9] : memref<128x1xf32, #tpu.memory_space<vmem>>, vector<128x1xf32>
    %13 = vector.broadcast %12 : vector<128x1xf32> to vector<128x256xf32>
    %14 = arith.addf %11, %13 : vector<128x256xf32>
    %cst_10 = arith.constant 0.000000e+00 : f32
    %15 = vector.broadcast %cst_10 : f32 to vector<128x256xf32>
    %16 = arith.maximumf %14, %15 : vector<128x256xf32>
    %c0_11 = arith.constant 0 : index
    %c0_12 = arith.constant 0 : index
    %17 = vector.load %arg6[%c0_11, %c0_12] : memref<128x128xf32, #tpu.memory_space<vmem>>, vector<128x128xf32>
    %cst_13 = arith.constant dense<0.000000e+00> : vector<128x256xf32>
    %18 = tpu.matmul %17, %16, %cst_13 {dimension_numbers = #tpu.dot_dimension_numbers<[1], [0], [0], [1], [0, 0, 1, 1], [], []>} : vector<128x128xf32>, vector<128x256xf32>, vector<128x256xf32> -> vector<128x256xf32>
    %c0_14 = arith.constant 0 : index
    %c0_15 = arith.constant 0 : index
    %19 = vector.load %arg7[%c0_14, %c0_15] : memref<128x1xf32, #tpu.memory_space<vmem>>, vector<128x1xf32>
    %20 = vector.broadcast %19 : vector<128x1xf32> to vector<128x256xf32>
    %21 = arith.addf %18, %20 : vector<128x256xf32>
    %cst_16 = arith.constant 0.000000e+00 : f32
    %22 = vector.broadcast %cst_16 : f32 to vector<128x256xf32>
    %23 = arith.maximumf %21, %22 : vector<128x256xf32>
    %c0_17 = arith.constant 0 : index
    %c0_18 = arith.constant 0 : index
    %24 = vector.load %arg8[%c0_17, %c0_18] : memref<1x128xf32, #tpu.memory_space<vmem>>, vector<1x128xf32>
    %cst_19 = arith.constant dense<0.000000e+00> : vector<1x256xf32>
    %25 = tpu.matmul %24, %23, %cst_19 {dimension_numbers = #tpu.dot_dimension_numbers<[1], [0], [0], [1], [0, 0, 1, 1], [], []>} : vector<1x128xf32>, vector<128x256xf32>, vector<1x256xf32> -> vector<1x256xf32>
    %c0_20 = arith.constant 0 : index
    %c0_21 = arith.constant 0 : index
    %26 = vector.load %arg9[%c0_20, %c0_21] : memref<1x1xf32, #tpu.memory_space<vmem>>, vector<1x1xf32>
    %27 = vector.broadcast %26 : vector<1x1xf32> to vector<1x256xf32>
    %28 = arith.addf %25, %27 : vector<1x256xf32>
    %c0_22 = arith.constant 0 : index
    %c0_23 = arith.constant 0 : index
    %29 = vector.load %arg10[%c0_22, %c0_23] : memref<1x256xf32, #tpu.memory_space<vmem>>, vector<1x256xf32>
    tpu.vector_store %arg10[%c0_22, %c0_23], %28 {strides = array<i32>} : memref<1x256xf32, #tpu.memory_space<vmem>>, vector<1x256xf32>,
    return
  }
  func.func @transform_0(%arg0: i32) -> (i32, i32) {
    %c0_i32 = arith.constant 0 : i32
    %c0_i32_0 = arith.constant 0 : i32
    return %c0_i32, %arg0 : i32, i32
  }
  func.func @transform_1(%arg0: i32) -> (i32, i32) {
    %c0_i32 = arith.constant 0 : i32
    %c0_i32_0 = arith.constant 0 : i32
    %c0_i32_1 = arith.constant 0 : i32
    return %c0_i32, %c0_i32_0 : i32, i32
  }
  func.func @transform_2(%arg0: i32) -> (i32, i32) {
    %c0_i32 = arith.constant 0 : i32
    %c0_i32_0 = arith.constant 0 : i32
    %c0_i32_1 = arith.constant 0 : i32
    return %c0_i32, %c0_i32_0 : i32, i32
  }
  func.func @transform_3(%arg0: i32) -> (i32, i32) {
    %c0_i32 = arith.constant 0 : i32
    %c0_i32_0 = arith.constant 0 : i32
    %c0_i32_1 = arith.constant 0 : i32
    return %c0_i32, %c0_i32_0 : i32, i32
  }
  func.func @transform_4(%arg0: i32) -> (i32, i32) {
    %c0_i32 = arith.constant 0 : i32
    %c0_i32_0 = arith.constant 0 : i32
    %c0_i32_1 = arith.constant 0 : i32
    return %c0_i32, %c0_i32_0 : i32, i32
  }
  func.func @transform_5(%arg0: i32) -> (i32, i32) {
    %c0_i32 = arith.constant 0 : i32
    %c0_i32_0 = arith.constant 0 : i32
    %c0_i32_1 = arith.constant 0 : i32
    return %c0_i32, %c0_i32_0 : i32, i32
  }
  func.func @transform_6(%arg0: i32) -> (i32, i32) {
    %c0_i32 = arith.constant 0 : i32
    %c0_i32_0 = arith.constant 0 : i32
    %c0_i32_1 = arith.constant 0 : i32
    return %c0_i32, %c0_i32_0 : i32, i32
  }
  func.func @transform_7(%arg0: i32) -> (i32, i32) {
    %c0_i32 = arith.constant 0 : i32
    %c0_i32_0 = arith.constant 0 : i32
    %c0_i32_1 = arith.constant 0 : i32
    return %c0_i32, %c0_i32_0 : i32, i32
  }
  func.func @transform_8(%arg0: i32) -> (i32, i32) {
    %c0_i32 = arith.constant 0 : i32
    %c0_i32_0 = arith.constant 0 : i32
    %c0_i32_1 = arith.constant 0 : i32
    return %c0_i32, %c0_i32_0 : i32, i32
  }
  func.func @transform_9(%arg0: i32) -> (i32, i32) {
    %c0_i32 = arith.constant 0 : i32
    %c0_i32_0 = arith.constant 0 : i32
    return %c0_i32, %arg0 : i32, i32
  }
}

</mosaic_0001>

<bundles_post_ra>
// kernel: tpu_custom_call.1
= control target key start
LH: loop header
LB: loop body
LE: loop exit
PB: predicated region body
PF: predicated region fallthrough
CT: control target
= control target key end

     0   :  { %s1622_s0 = inlined_call_operand.vmem [shape: f32[1,256], index: 0, kind: input, shape index: {}]   ;;  %s1623_s1 = inlined_call_operand.vmem [shape: f32[128,1], index: 1, kind: input, shape index: {}]   ;;  %s1624_s2 = inlined_call_operand.vmem [shape: f32[128,1], index: 2, kind: input, shape index: {}]   ;;  %s1625_s3 = inlined_call_operand.vmem [shape: f32[128,128], index: 3, kind: input, shape index: {}]   ;;  %s1626_s4 = inlined_call_operand.vmem [shape: f32[128,1], index: 4, kind: input, shape index: {}]   ;;  %s1627_s5 = inlined_call_operand.vmem [shape: f32[128,128], index: 5, kind: input, shape index: {}]   ;;  %s1628_s6 = inlined_call_operand.vmem [shape: f32[128,1], index: 6, kind: input, shape index: {}]   ;;  %s1629_s7 = inlined_call_operand.vmem [shape: f32[1,128], index: 7, kind: input, shape index: {}]   ;;  %s1630_s8 = inlined_call_operand.<no memory space> [shape: f32[1,1], index: 8, kind: input, shape index: {}]   ;;  %s1631_s9 = inlined_call_operand.hbm [shape: f32[1,256], index: 9, kind: output, shape index: {}]  }
   0x1   :  { %v14_v0 = vstv %s1630_s8 }
   0x2   :  { %15 = vst [vmem:[#allocation2] sm:$0x1] %v14_v0 }
   0x3   :  { %v190_v1 = vld [vmem:[%s1624_s2 + $0x78] sm:$0xff]  ;;  %v1092_v3 = vmov 0   ;;  %v50_v4 = vld [vmem:[%s1623_s1 + $0x70] sm:$0xff]  ;;  %v49_v5 = vld [vmem:[%s1623_s1 + $0x68] sm:$0xff] }
   0x4   :  { %v51_v2 = vld [vmem:[%s1623_s1 + $0x78] sm:$0xff]  ;;  %1069 = vset.pattern.permute.xlu1 %v1092_v3  ;;  %1068 = vset.pattern.permute.xlu0 %v1092_v3  ;;  %v189_v6 = vld [vmem:[%s1624_s2 + $0x70] sm:$0xff]  ;;  %v48_v7 = vld [vmem:[%s1623_s1 + $0x60] sm:$0xff] }
   0x5   :  { %268 = vperm.xlu1 %1069, %v190_v1   ;;  %129 = vperm.xlu0 %1068, %v51_v2   ;;  %v188_v8 = vld [vmem:[%s1624_s2 + $0x68] sm:$0xff]  ;;  %v47_v9 = vld [vmem:[%s1623_s1 + $0x58] sm:$0xff]  ;;  %v187_v10 = vld [vmem:[%s1624_s2 + $0x60] sm:$0xff] }
   0x6   :  { %v46_v11 = vld [vmem:[%s1623_s1 + $0x50] sm:$0xff]  ;;  %v186_v12 = vld [vmem:[%s1624_s2 + $0x58] sm:$0xff]  ;;  %v45_v13 = vld [vmem:[%s1623_s1 + $0x48] sm:$0xff] }
   0x9   :  { %124 = vperm.xlu0 %1068, %v50_v4   ;;  %119 = vperm.xlu1 %1069, %v49_v5  }
   0xd   :  { %263 = vperm.xlu0 %1068, %v189_v6   ;;  %114 = vperm.xlu1 %1069, %v48_v7  }
  0x11   :  { %258 = vperm.xlu0 %1068, %v188_v8   ;;  %109 = vperm.xlu1 %1069, %v47_v9  }
  0x15   :  { %253 = vperm.xlu0 %1068, %v187_v10   ;;  %104 = vperm.xlu1 %1069, %v46_v11  }
  0x19   :  { %248 = vperm.xlu0 %1068, %v186_v12   ;;  %99 = vperm.xlu1 %1069, %v45_v13  }
  0x1a   :  { %16 = vsyncpa [#allocation4], 0  ;;  %v185_v14 = vld [vmem:[%s1624_s2 + $0x50] sm:$0xff]  ;;  %v44_v15 = vld [vmem:[%s1623_s1 + $0x40] sm:$0xff]  ;;  %v1093_v36 = vmov 0.0   ;;  %v133_v59 = vlaneseq  ;;  %s1095_s29 = smov [#allocation3]  }
  0x1b   :  { %v184_v16 = vld [vmem:[%s1624_s2 + $0x48] sm:$0xff]  ;;  %v43_v17 = vld [vmem:[%s1623_s1 + $0x38] sm:$0xff]  ;;  %v183_v18 = vld [vmem:[%s1624_s2 + $0x40] sm:$0xff]  ;;  %511 = vmatprep.mubr.f32.mxu0 %v1093_v36  ;;  %816 = vmatprep.mubr.f32.mxu1 %v1093_v36  ;;  %s1056_s30 = sshll.u32 %s1095_s29, 4  ;;  %s1057_s30 = int_to_ptr.vmem [resolvable:$true] %s1056_s30 }
  0x1c   :  { %v42_v19 = vld [vmem:[%s1623_s1 + $0x30] sm:$0xff]  ;;  %v182_v20 = vld [vmem:[%s1624_s2 + $0x38] sm:$0xff]  ;;  %v41_v21 = vld [vmem:[%s1623_s1 + $0x28] sm:$0xff]  ;;  %v1326_v62 = vshrl.u32 %v133_v59, 7  ;;  %vm1047_vm0 = vcmp.lt.s32.totalorder %v133_v59, 256  ;;  %p1075_p1 = scmp.lt.s32.totalorder %s1057_s30, %s1057_s30 }
  0x1d   :  { %243 = vperm.xlu0 %1068, %v185_v14   ;;  %94 = vperm.xlu1 %1069, %v44_v15   ;;  %v181_v22 = vld [vmem:[%s1624_s2 + $0x30] sm:$0xff]  ;;  %v40_v23 = vld [vmem:[%s1623_s1 + $0x20] sm:$0xff]  ;;  %v180_v24 = vld [vmem:[%s1624_s2 + $0x28] sm:$0xff] }
  0x1e   :  { %v39_v25 = vld [vmem:[%s1623_s1 + $0x18] sm:$0xff]  ;;  %v179_v26 = vld [vmem:[%s1624_s2 + $0x20] sm:$0xff]  ;;  %v38_v27 = vld [vmem:[%s1623_s1 + $0x10] sm:$0xff]  ;;  %v135_v1 = vsub.s32 0, %v1326_v62  ;;  %v139_v2 = vsub.s32 1, %v1326_v62 }
  0x1f   :  { %v178_v28 = vld [vmem:[%s1624_s2 + $0x18] sm:$0xff]  ;;  %v37_v29 = vld [vmem:[%s1623_s1 + $0x8] sm:$0xff]  ;;  %v177_v30 = vld [vmem:[%s1624_s2 + $0x10] sm:$0xff] }
  0x20   :  { %v36_v31 = vld [vmem:[%s1623_s1] sm:$0xff]  ;;  %v176_v32 = vld [vmem:[%s1624_s2 + $0x8] sm:$0xff]  ;;  %v366_v34 = vld [vmem:[%s1626_s4 + $0x78] sm:$0xff] }
  0x21   :  { %238 = vperm.xlu0 %1068, %v184_v16   ;;  %89 = vperm.xlu1 %1069, %v43_v17   ;;  %v175_v33 = vld [vmem:[%s1624_s2] sm:$0xff]  ;;  %v365_v35 = vld [vmem:[%s1626_s4 + $0x70] sm:$0xff]  ;;  %v364_v37 = vld [vmem:[%s1626_s4 + $0x68] sm:$0xff] }
  0x22   :  { %v363_v38 = vld [vmem:[%s1626_s4 + $0x60] sm:$0xff]  ;;  %v362_v39 = vld [vmem:[%s1626_s4 + $0x58] sm:$0xff]  ;;  %v361_v40 = vld [vmem:[%s1626_s4 + $0x50] sm:$0xff] }
  0x23   :  { %v360_v41 = vld [vmem:[%s1626_s4 + $0x48] sm:$0xff]  ;;  %v359_v42 = vld [vmem:[%s1626_s4 + $0x40] sm:$0xff]  ;;  %v358_v43 = vld [vmem:[%s1626_s4 + $0x38] sm:$0xff] }
  0x24   :  { %v357_v44 = vld [vmem:[%s1626_s4 + $0x30] sm:$0xff]  ;;  %v356_v45 = vld [vmem:[%s1626_s4 + $0x28] sm:$0xff]  ;;  %v355_v46 = vld [vmem:[%s1626_s4 + $0x20] sm:$0xff] }
  0x25   :  { %233 = vperm.xlu0 %1068, %v183_v18   ;;  %84 = vperm.xlu1 %1069, %v42_v19   ;;  %v354_v47 = vld [vmem:[%s1626_s4 + $0x18] sm:$0xff]  ;;  %v353_v48 = vld [vmem:[%s1626_s4 + $0x10] sm:$0xff]  ;;  %v352_v49 = vld [vmem:[%s1626_s4 + $0x8] sm:$0xff] }
  0x26   :  { %v351_v50 = vld [vmem:[%s1626_s4] sm:$0xff]  ;;  %v671_v51 = vld [vmem:[%s1628_s6 + $0x78] sm:$0xff]  ;;  %v670_v52 = vld [vmem:[%s1628_s6 + $0x70] sm:$0xff] }
  0x27   :  { %v669_v53 = vld [vmem:[%s1628_s6 + $0x68] sm:$0xff]  ;;  %v668_v54 = vld [vmem:[%s1628_s6 + $0x60] sm:$0xff]  ;;  %v667_v55 = vld [vmem:[%s1628_s6 + $0x58] sm:$0xff] }
  0x28   :  { %v666_v56 = vld [vmem:[%s1628_s6 + $0x50] sm:$0xff]  ;;  %v665_v57 = vld [vmem:[%s1628_s6 + $0x48] sm:$0xff]  ;;  %v664_v58 = vld [vmem:[%s1628_s6 + $0x40] sm:$0xff] }
  0x29   :  { %228 = vperm.xlu0 %1068, %v182_v20   ;;  %79 = vperm.xlu1 %1069, %v41_v21   ;;  %v663_v60 = vld [vmem:[%s1628_s6 + $0x38] sm:$0xff]  ;;  %v662_v61 = vld [vmem:[%s1628_s6 + $0x30] sm:$0xff]  ;;  %v661_v63 = vld [vmem:[%s1628_s6 + $0x28] sm:$0xff] }
  0x2a   :  { %v660_v0 = vld [vmem:[%s1628_s6 + $0x20] sm:$0xff]  ;;  %v659_v3 = vld [vmem:[%s1628_s6 + $0x18] sm:$0xff]  ;;  %v658_v4 = vld [vmem:[%s1628_s6 + $0x10] sm:$0xff] }
  0x2b   :  { %v35_v5 = vld [vmem:[%s1622_s0] sm:$0x3]  ;;  %v657_v8 = vld [vmem:[%s1628_s6 + $0x8] sm:$0xff] }
  0x2c   :  { %v1347_v6 = vrot.slane %v35_v5, %v135_v1  ;;  %v1349_v7 = vrot.slane %v35_v5, %v139_v2  ;;  %v656_v9 = vld [vmem:[%s1628_s6] sm:$0xff] }
  0x2d   :  { %223 = vperm.xlu0 %1068, %v181_v22   ;;  %74 = vperm.xlu1 %1069, %v40_v23   ;;  %v946_v14 = vld [vmem:[#allocation2] sm:$0x1] }
  0x31   :  { %218 = vperm.xlu0 %1068, %v180_v24   ;;  %69 = vperm.xlu1 %1069, %v39_v25  }
  0x35   :  { %213 = vperm.xlu0 %1068, %v179_v26   ;;  %64 = vperm.xlu1 %1069, %v38_v27  }
  0x39   :  { %208 = vperm.xlu0 %1068, %v178_v28   ;;  %59 = vperm.xlu1 %1069, %v37_v29  }
  0x3d   :  { %203 = vperm.xlu0 %1068, %v177_v30   ;;  %54 = vperm.xlu1 %1069, %v36_v31  }
  0x41   :  { %198 = vperm.xlu0 %1068, %v176_v32   ;;  %193 = vperm.xlu1 %1069, %v175_v33  }
  0x45   :  { %444 = vperm.xlu0 %1068, %v366_v34   ;;  %439 = vperm.xlu1 %1069, %v365_v35  }
  0x49   :  { %434 = vperm.xlu0 %1068, %v364_v37   ;;  %429 = vperm.xlu1 %1069, %v363_v38  }
  0x4d   :  { %424 = vperm.xlu0 %1068, %v362_v39   ;;  %419 = vperm.xlu1 %1069, %v361_v40  }
  0x51   :  { %414 = vperm.xlu0 %1068, %v360_v41   ;;  %409 = vperm.xlu1 %1069, %v359_v42  }
  0x55   :  { %404 = vperm.xlu0 %1068, %v358_v43   ;;  %399 = vperm.xlu1 %1069, %v357_v44  }
  0x59   :  { %394 = vperm.xlu0 %1068, %v356_v45   ;;  %389 = vperm.xlu1 %1069, %v355_v46  }
  0x5d   :  { %384 = vperm.xlu0 %1068, %v354_v47   ;;  %379 = vperm.xlu1 %1069, %v353_v48  }
  0x61   :  { %374 = vperm.xlu0 %1068, %v352_v49   ;;  %369 = vperm.xlu1 %1069, %v351_v50  }
  0x65   :  { %749 = vperm.xlu0 %1068, %v671_v51   ;;  %744 = vperm.xlu1 %1069, %v670_v52  }
  0x69   :  { %739 = vperm.xlu0 %1068, %v669_v53   ;;  %734 = vperm.xlu1 %1069, %v668_v54  }
  0x6d   :  { %729 = vperm.xlu0 %1068, %v667_v55   ;;  %724 = vperm.xlu1 %1069, %v666_v56  }
  0x71   :  { %719 = vperm.xlu0 %1068, %v665_v57   ;;  %714 = vperm.xlu1 %1069, %v664_v58  }
  0x75   :  { %709 = vperm.xlu0 %1068, %v663_v60   ;;  %704 = vperm.xlu1 %1069, %v662_v61  }
  0x79   :  { %699 = vperm.xlu0 %1068, %v661_v63   ;;  %694 = vperm.xlu1 %1069, %v660_v0  }
  0x7d   :  { %689 = vperm.xlu0 %1068, %v659_v3   ;;  %684 = vperm.xlu1 %1069, %v658_v4  }
  0x80   :  { %v269_v10 = vpop.permute.xlu1 %268  ;;  %v130_v11 = vpop.permute.xlu0 %129 }
  0x81   :  { %v173_v12 = vmul.f32 %v1347_v6, %v130_v11  ;;  %v174_v13 = vmul.f32 %v1349_v7, %v130_v11  ;;  %679 = vperm.xlu0 %1068, %v657_v8   ;;  %674 = vperm.xlu1 %1069, %v656_v9  }
  0x83   :  { %v302_v15 = vadd.f32 %v269_v10, %v174_v13  ;;  %v301_v16 = vadd.f32 %v269_v10, %v173_v12 }
  0x84   :  { %v125_v17 = vpop.permute.xlu0 %124  ;;  %v120_v18 = vpop.permute.xlu1 %119 }
  0x85   :  { %949 = vperm.xlu0 %1068, %v946_v14   ;;  %v334_v19 = vmax.f32 %v302_v15, 0.0  ;;  %v333_v20 = vmax.f32 %v301_v16, 0.0  ;;  %v171_v21 = vmul.f32 %v1347_v6, %v125_v17  ;;  %v172_v22 = vmul.f32 %v1349_v7, %v125_v17 }
  0x86   :  { %v169_v27 = vmul.f32 %v1347_v6, %v120_v18  ;;  %v170_v28 = vmul.f32 %v1349_v7, %v120_v18 }
  0x87   :  { %447 = vmatprep.subr.mxu0 %v334_v19 }
  0x88   :  { %v264_v23 = vpop.permute.xlu0 %263  ;;  %v115_v24 = vpop.permute.xlu1 %114  ;;  %448 = vmatpush1.msra.mxu0 %v333_v20 }
  0x89   :  { %v299_v25 = vadd.f32 %v264_v23, %v171_v21  ;;  %v300_v26 = vadd.f32 %v264_v23, %v172_v22  ;;  %v167_v35 = vmul.f32 %v1347_v6, %v115_v24  ;;  %v168_v37 = vmul.f32 %v1349_v7, %v115_v24 }
  0x8b   :  { %v331_v29 = vmax.f32 %v299_v25, 0.0  ;;  %v332_v30 = vmax.f32 %v300_v26, 0.0 }
  0x8c   :  { %v259_v31 = vpop.permute.xlu0 %258  ;;  %v110_v32 = vpop.permute.xlu1 %109 }
  0x8d   :  { %v297_v33 = vadd.f32 %v259_v31, %v169_v27  ;;  %v298_v34 = vadd.f32 %v259_v31, %v170_v28  ;;  %449 = vmatprep.subr.mxu0 %v332_v30  ;;  %v165_v44 = vmul.f32 %v1347_v6, %v110_v32  ;;  %v166_v45 = vmul.f32 %v1349_v7, %v110_v32 }
  0x8e   :  { %450 = vmatpush1.msra.mxu0 %v331_v29 }
  0x8f   :  { %v329_v38 = vmax.f32 %v297_v33, 0.0  ;;  %v330_v39 = vmax.f32 %v298_v34, 0.0 }
  0x90   :  { %v254_v40 = vpop.permute.xlu0 %253  ;;  %v105_v41 = vpop.permute.xlu1 %104 }
  0x91   :  { %v295_v42 = vadd.f32 %v254_v40, %v167_v35  ;;  %v296_v43 = vadd.f32 %v254_v40, %v168_v37  ;;  %451 = vmatprep.subr.mxu0 %v330_v39  ;;  %v163_v52 = vmul.f32 %v1347_v6, %v105_v41  ;;  %v164_v53 = vmul.f32 %v1349_v7, %v105_v41 }
  0x92   :  { %452 = vmatpush1.msra.mxu0 %v329_v38 }
  0x93   :  { %v327_v46 = vmax.f32 %v295_v42, 0.0  ;;  %v328_v47 = vmax.f32 %v296_v43, 0.0 }
  0x94   :  { %v249_v48 = vpop.permute.xlu0 %248  ;;  %v100_v49 = vpop.permute.xlu1 %99 }
  0x95   :  { %v293_v50 = vadd.f32 %v249_v48, %v165_v44  ;;  %v294_v51 = vadd.f32 %v249_v48, %v166_v45  ;;  %453 = vmatprep.subr.mxu0 %v328_v47  ;;  %v161_v61 = vmul.f32 %v1347_v6, %v100_v49  ;;  %v162_v63 = vmul.f32 %v1349_v7, %v100_v49 }
  0x96   :  { %454 = vmatpush1.msra.mxu0 %v327_v46 }
  0x97   :  { %v325_v54 = vmax.f32 %v293_v50, 0.0  ;;  %v326_v55 = vmax.f32 %v294_v51, 0.0 }
  0x98   :  { %v244_v56 = vpop.permute.xlu0 %243  ;;  %v95_v57 = vpop.permute.xlu1 %94 }
  0x99   :  { %v291_v58 = vadd.f32 %v244_v56, %v163_v52  ;;  %v292_v60 = vadd.f32 %v244_v56, %v164_v53  ;;  %455 = vmatprep.subr.mxu0 %v326_v55  ;;  %v159_v9 = vmul.f32 %v1347_v6, %v95_v57  ;;  %v160_v10 = vmul.f32 %v1349_v7, %v95_v57 }
  0x9a   :  { %456 = vmatpush1.msra.mxu0 %v325_v54 }
  0x9b   :  { %v323_v0 = vmax.f32 %v291_v58, 0.0  ;;  %v324_v2 = vmax.f32 %v292_v60, 0.0 }
  0x9c   :  { %v239_v3 = vpop.permute.xlu0 %238  ;;  %v90_v4 = vpop.permute.xlu1 %89 }
  0x9d   :  { %v289_v5 = vadd.f32 %v239_v3, %v161_v61  ;;  %v290_v8 = vadd.f32 %v239_v3, %v162_v63  ;;  %457 = vmatprep.subr.mxu0 %v324_v2  ;;  %v157_v17 = vmul.f32 %v1347_v6, %v90_v4  ;;  %v158_v18 = vmul.f32 %v1349_v7, %v90_v4 }
  0x9e   :  { %458 = vmatpush1.msra.mxu0 %v323_v0 }
  0x9f   :  { %v321_v11 = vmax.f32 %v289_v5, 0.0  ;;  %v322_v12 = vmax.f32 %v290_v8, 0.0 }
  0xa0   :  { %v234_v13 = vpop.permute.xlu0 %233  ;;  %v85_v14 = vpop.permute.xlu1 %84 }
  0xa1   :  { %v287_v15 = vadd.f32 %v234_v13, %v159_v9  ;;  %v288_v16 = vadd.f32 %v234_v13, %v160_v10  ;;  %459 = vmatprep.subr.mxu0 %v322_v12  ;;  %v155_v25 = vmul.f32 %v1347_v6, %v85_v14  ;;  %v156_v26 = vmul.f32 %v1349_v7, %v85_v14 }
  0xa2   :  { %460 = vmatpush1.msra.mxu0 %v321_v11 }
  0xa3   :  { %v319_v19 = vmax.f32 %v287_v15, 0.0  ;;  %v320_v20 = vmax.f32 %v288_v16, 0.0 }
  0xa4   :  { %v229_v21 = vpop.permute.xlu0 %228  ;;  %v80_v22 = vpop.permute.xlu1 %79 }
  0xa5   :  { %v285_v23 = vadd.f32 %v229_v21, %v157_v17  ;;  %v286_v24 = vadd.f32 %v229_v21, %v158_v18  ;;  %461 = vmatprep.subr.mxu0 %v320_v20  ;;  %v153_v33 = vmul.f32 %v1347_v6, %v80_v22  ;;  %v154_v34 = vmul.f32 %v1349_v7, %v80_v22 }
  0xa6   :  { %462 = vmatpush1.msra.mxu0 %v319_v19 }
  0xa7   :  { %v317_v27 = vmax.f32 %v285_v23, 0.0  ;;  %v318_v28 = vmax.f32 %v286_v24, 0.0  ;;  %v337_v23 = vld [vmem:[%s1625_s3 + $0x10] sm:$0xff]  ;;  %v338_v24 = vld [vmem:[%s1625_s3 + $0x18] sm:$0xff] }
  0xa8   :  { %v224_v29 = vpop.permute.xlu0 %223  ;;  %v75_v30 = vpop.permute.xlu1 %74 }
  0xa9   :  { %v283_v31 = vadd.f32 %v224_v29, %v155_v25  ;;  %v284_v32 = vadd.f32 %v224_v29, %v156_v26  ;;  %463 = vmatprep.subr.mxu0 %v318_v28  ;;  %v151_v42 = vmul.f32 %v1347_v6, %v75_v30  ;;  %v152_v43 = vmul.f32 %v1349_v7, %v75_v30  ;;  %v339_v25 = vld [vmem:[%s1625_s3 + $0x20] sm:$0xff]  ;;  %v340_v26 = vld [vmem:[%s1625_s3 + $0x28] sm:$0xff]  ;;  %v342_v28 = vld [vmem:[%s1625_s3 + $0x38] sm:$0xff] }
  0xaa   :  { %464 = vmatpush1.msra.mxu0 %v317_v27  ;;  %v341_v27 = vld [vmem:[%s1625_s3 + $0x30] sm:$0xff]  ;;  %v343_v29 = vld [vmem:[%s1625_s3 + $0x40] sm:$0xff]  ;;  %v344_v30 = vld [vmem:[%s1625_s3 + $0x48] sm:$0xff] }
  0xab   :  { %v315_v35 = vmax.f32 %v283_v31, 0.0  ;;  %v316_v37 = vmax.f32 %v284_v32, 0.0  ;;  %v345_v31 = vld [vmem:[%s1625_s3 + $0x50] sm:$0xff]  ;;  %v346_v32 = vld [vmem:[%s1625_s3 + $0x58] sm:$0xff] }
  0xac   :  { %v219_v38 = vpop.permute.xlu0 %218  ;;  %v70_v39 = vpop.permute.xlu1 %69 }
  0xad   :  { %v281_v40 = vadd.f32 %v219_v38, %v153_v33  ;;  %v282_v41 = vadd.f32 %v219_v38, %v154_v34  ;;  %465 = vmatprep.subr.mxu0 %v316_v37  ;;  %v149_v50 = vmul.f32 %v1347_v6, %v70_v39  ;;  %v150_v51 = vmul.f32 %v1349_v7, %v70_v39  ;;  %v347_v33 = vld [vmem:[%s1625_s3 + $0x60] sm:$0xff]  ;;  %v348_v34 = vld [vmem:[%s1625_s3 + $0x68] sm:$0xff]  ;;  %v350_v37 = vld [vmem:[%s1625_s3 + $0x78] sm:$0xff] }
  0xae   :  { %466 = vmatpush1.msra.mxu0 %v315_v35  ;;  %v349_v35 = vld [vmem:[%s1625_s3 + $0x70] sm:$0xff] }
  0xaf   :  { %v313_v44 = vmax.f32 %v281_v40, 0.0  ;;  %v314_v45 = vmax.f32 %v282_v41, 0.0 }
  0xb0   :  { %v214_v46 = vpop.permute.xlu0 %213  ;;  %v65_v47 = vpop.permute.xlu1 %64 }
  0xb1   :  { %v279_v48 = vadd.f32 %v214_v46, %v151_v42  ;;  %v280_v49 = vadd.f32 %v214_v46, %v152_v43  ;;  %467 = vmatprep.subr.mxu0 %v314_v45  ;;  %v147_v58 = vmul.f32 %v1347_v6, %v65_v47  ;;  %v148_v60 = vmul.f32 %v1349_v7, %v65_v47 }
  0xb2   :  { %468 = vmatpush1.msra.mxu0 %v313_v44 }
  0xb3   :  { %v311_v52 = vmax.f32 %v279_v48, 0.0  ;;  %v312_v53 = vmax.f32 %v280_v49, 0.0 }
  0xb4   :  { %v209_v54 = vpop.permute.xlu0 %208  ;;  %v60_v55 = vpop.permute.xlu1 %59 }
  0xb5   :  { %v277_v56 = vadd.f32 %v209_v54, %v149_v50  ;;  %v278_v57 = vadd.f32 %v209_v54, %v150_v51  ;;  %469 = vmatprep.subr.mxu0 %v312_v53  ;;  %v145_v5 = vmul.f32 %v1347_v6, %v60_v55  ;;  %v146_v8 = vmul.f32 %v1349_v7, %v60_v55 }
  0xb6   :  { %470 = vmatpush1.msra.mxu0 %v311_v52 }
  0xb7   :  { %v309_v61 = vmax.f32 %v277_v56, 0.0  ;;  %v310_v63 = vmax.f32 %v278_v57, 0.0 }
  0xb8   :  { %v204_v0 = vpop.permute.xlu0 %203  ;;  %v55_v2 = vpop.permute.xlu1 %54 }
  0xb9   :  { %v275_v3 = vadd.f32 %v204_v0, %v147_v58  ;;  %v276_v4 = vadd.f32 %v204_v0, %v148_v60  ;;  %471 = vmatprep.subr.mxu0 %v310_v63  ;;  %v144_v11 = vmul.f32 %v1349_v7, %v55_v2  ;;  %v143_v12 = vmul.f32 %v1347_v6, %v55_v2  ;;  %v335_v7 = vld [vmem:[%s1625_s3] sm:$0xff]  ;;  %v336_v6 = vld [vmem:[%s1625_s3 + $0x8] sm:$0xff] }
  0xba   :  { %472 = vmatpush1.msra.mxu0 %v309_v61 }
  0xbb   :  { %v307_v9 = vmax.f32 %v275_v3, 0.0  ;;  %v308_v10 = vmax.f32 %v276_v4, 0.0 }
  0xbc   :  { %v199_v13 = vpop.permute.xlu0 %198  ;;  %v194_v14 = vpop.permute.xlu1 %193 }
  0xbd   :  { %v273_v15 = vadd.f32 %v199_v13, %v145_v5  ;;  %v274_v16 = vadd.f32 %v199_v13, %v146_v8  ;;  %v272_v17 = vadd.f32 %v194_v14, %v144_v11  ;;  %473 = vmatprep.subr.mxu0 %v308_v10  ;;  %v271_v18 = vadd.f32 %v194_v14, %v143_v12 }
  0xbe   :  { %474 = vmatpush1.msra.mxu0 %v307_v9 }
  0xbf   :  { %v305_v19 = vmax.f32 %v273_v15, 0.0  ;;  %v306_v20 = vmax.f32 %v274_v16, 0.0  ;;  %v304_v21 = vmax.f32 %v272_v17, 0.0  ;;  %v303_v22 = vmax.f32 %v271_v18, 0.0 }
  0xc0   :  { %v445_v63 = vpop.permute.xlu0 %444  ;;  %v440_v2 = vpop.permute.xlu1 %439 }
  0xc1   :  { %475 = vmatprep.subr.mxu0 %v306_v20 }
  0xc2   :  { %476 = vmatpush1.msra.mxu0 %v305_v19 }
  0xc3   :  { %477 = vmatprep.subr.mxu0 %v304_v21 }
  0xc4   :  { %478 = vmatpush1.msra.mxu0 %v303_v22  ;;  %v435_v5 = vpop.permute.xlu0 %434  ;;  %v430_v9 = vpop.permute.xlu1 %429 }
  0xc5   :  { %512 = vmatmul.mubr.f32.vlgmr.msra.gmra.mxu0 %v335_v7 }
  0xc6   :  { %517 = vmatprep.mubr.f32.mxu0 %v1093_v36 }
  0xc8   :  { %v425_v12 = vpop.permute.xlu0 %424  ;;  %v420_v14 = vpop.permute.xlu1 %419 }
  0xc9   :  { %518 = vmatmul.mubr.f32.gmra.mxu0 %v336_v6 }
  0xca   :  { %523 = vmatprep.mubr.f32.mxu0 %v1093_v36 }
  0xcc   :  { %v415_v20 = vpop.permute.xlu0 %414  ;;  %v410_v6 = vpop.permute.xlu1 %409 }
  0xcd   :  { %524 = vmatmul.mubr.f32.gmra.mxu0 %v337_v23 }
  0xce   :  { %529 = vmatprep.mubr.f32.mxu0 %v1093_v36 }
  0xd1   :  { %530 = vmatmul.mubr.f32.gmra.mxu0 %v338_v24 }
  0xd2   :  { %535 = vmatprep.mubr.f32.mxu0 %v1093_v36 }
  0xd5   :  { %536 = vmatmul.mubr.f32.gmra.mxu0 %v339_v25 }
  0xd6   :  { %541 = vmatprep.mubr.f32.mxu0 %v1093_v36 }
  0xd9   :  { %542 = vmatmul.mubr.f32.gmra.mxu0 %v340_v26 }
  0xda   :  { %547 = vmatprep.mubr.f32.mxu0 %v1093_v36 }
  0xdd   :  { %548 = vmatmul.mubr.f32.gmra.mxu0 %v341_v27 }
  0xde   :  { %553 = vmatprep.mubr.f32.mxu0 %v1093_v36 }
  0xe1   :  { %554 = vmatmul.mubr.f32.gmra.mxu0 %v342_v28 }
  0xe2   :  { %559 = vmatprep.mubr.f32.mxu0 %v1093_v36 }
  0xe5   :  { %560 = vmatmul.mubr.f32.gmra.mxu0 %v343_v29 }
  0xe6   :  { %565 = vmatprep.mubr.f32.mxu0 %v1093_v36 }
  0xe9   :  { %566 = vmatmul.mubr.f32.gmra.mxu0 %v344_v30 }
  0xea   :  { %571 = vmatprep.mubr.f32.mxu0 %v1093_v36 }
  0xed   :  { %572 = vmatmul.mubr.f32.gmra.mxu0 %v345_v31  ;;  %v405_v31 = vpop.permute.xlu0 %404 }
  0xee   :  { %577 = vmatprep.mubr.f32.mxu0 %v1093_v36 }
  0xf1   :  { %578 = vmatmul.mubr.f32.gmra.mxu0 %v346_v32 }
  0xf2   :  { %583 = vmatprep.mubr.f32.mxu0 %v1093_v36 }
  0xf5   :  { %584 = vmatmul.mubr.f32.gmra.mxu0 %v347_v33 }
  0xf6   :  { %589 = vmatprep.mubr.f32.mxu0 %v1093_v36 }
  0xf9   :  { %590 = vmatmul.mubr.f32.gmra.mxu0 %v348_v34 }
  0xfa   :  { %595 = vmatprep.mubr.f32.mxu0 %v1093_v36 }
  0xfd   :  { %596 = vmatmul.mubr.f32.gmra.mxu0 %v349_v35 }
  0xfe   :  { %601 = vmatprep.mubr.f32.mxu0 %v1093_v36 }
 0x101   :  { %602 = vmatmul.mubr.f32.gmra.mxu0 %v350_v37  ;;  %v400_v37 = vpop.permute.xlu1 %399 }
 0x102   :  { %1020 = vmatprep.mubr.f32.mxu0 %v1093_v36 }
 0x185   :  { %v1453_v38 = vpop.f32.mrf.mxu0 }
 0x187   :  { %v1455_v39 = vpop.f32.mrf.mxu0 }
 0x189   :  { %v1457_v40 = vpop.f32.mrf.mxu0 }
 0x18b   :  { %v1459_v41 = vpop.f32.mrf.mxu0 }
 0x18d   :  { %v1461_v42 = vpop.f32.mrf.mxu0 }
 0x18f   :  { %v1463_v43 = vpop.f32.mrf.mxu0 }
 0x191   :  { %v1465_v44 = vpop.f32.mrf.mxu0 }
 0x193   :  { %v1467_v45 = vpop.f32.mrf.mxu0 }
 0x195   :  { %v1469_v46 = vpop.f32.mrf.mxu0 }
 0x197   :  { %v1471_v47 = vpop.f32.mrf.mxu0 }
 0x199   :  { %v1473_v48 = vpop.f32.mrf.mxu0 }
 0x19b   :  { %v1475_v49 = vpop.f32.mrf.mxu0 }
 0x19d   :  { %v1477_v50 = vpop.f32.mrf.mxu0 }
 0x19f   :  { %v1479_v51 = vpop.f32.mrf.mxu0 }
 0x1a1   :  { %v1481_v52 = vpop.f32.mrf.mxu0 }
 0x1a3   :  { %v1483_v53 = vpop.f32.mrf.mxu0 }
 0x1a5   :  { %v561_v54 = vpop.f32.mrf.mxu0 }
 0x1a7   :  { %v563_v55 = vpop.f32.mrf.mxu0 }
 0x1a9   :  { %v567_v56 = vpop.f32.mrf.mxu0 }
 0x1ab   :  { %v569_v57 = vpop.f32.mrf.mxu0 }
 0x1ad   :  { %v573_v58 = vpop.f32.mrf.mxu0 }
 0x1af   :  { %v575_v60 = vpop.f32.mrf.mxu0 }
 0x1b0   :  { %v576_v34 = vadd.f32 %v575_v60, %v420_v14  ;;  %v558_v60 = vadd.f32 %v1483_v53, %v405_v31 }
 0x1b1   :  { %v579_v61 = vpop.f32.mrf.mxu0 }
 0x1b2   :  { %v580_v32 = vadd.f32 %v579_v61, %v425_v12  ;;  %v562_v61 = vadd.f32 %v561_v54, %v410_v6 }
 0x1b3   :  { %v581_v0 = vpop.f32.mrf.mxu0 }
 0x1b4   :  { %v582_v29 = vadd.f32 %v581_v0, %v425_v12  ;;  %v564_v0 = vadd.f32 %v563_v55, %v410_v6  ;;  %v550_v55 = vadd.f32 %v1477_v50, %v400_v37 }
 0x1b5   :  { %v585_v3 = vpop.f32.mrf.mxu0 }
 0x1b6   :  { %v586_v27 = vadd.f32 %v585_v3, %v430_v9  ;;  %v568_v3 = vadd.f32 %v567_v56, %v415_v20  ;;  %v552_v56 = vadd.f32 %v1479_v51, %v400_v37  ;;  %v647_v37 = vld [vmem:[%s1627_s5 + $0x38] sm:$0xff] }
 0x1b7   :  { %v587_v4 = vpop.f32.mrf.mxu0 }
 0x1b8   :  { %v588_v25 = vadd.f32 %v587_v4, %v430_v9  ;;  %v570_v4 = vadd.f32 %v569_v57, %v415_v20  ;;  %v629_v9 = vmax.f32 %v576_v34, 0.0  ;;  %v626_v57 = vmax.f32 %v568_v3, 0.0  ;;  %v645_v34 = vld [vmem:[%s1627_s5 + $0x28] sm:$0xff]  ;;  %v652_v3 = vld [vmem:[%s1627_s5 + $0x60] sm:$0xff] }
 0x1b9   :  { %v591_v8 = vpop.f32.mrf.mxu0 }
 0x1ba   :  { %v592_v23 = vadd.f32 %v591_v8, %v435_v5  ;;  %v633_v35 = vmax.f32 %v588_v25, 0.0  ;;  %v630_v8 = vmax.f32 %v580_v32, 0.0  ;;  %v627_v12 = vmax.f32 %v570_v4, 0.0  ;;  %v643_v32 = vld [vmem:[%s1627_s5 + $0x18] sm:$0xff]  ;;  %v650_v4 = vld [vmem:[%s1627_s5 + $0x50] sm:$0xff] }
 0x1bb   :  { %v593_v10 = vpop.f32.mrf.mxu0 }
 0x1bc   :  { %v594_v22 = vadd.f32 %v593_v10, %v435_v5  ;;  %v634_v33 = vmax.f32 %v592_v23, 0.0  ;;  %v631_v5 = vmax.f32 %v582_v29, 0.0  ;;  %v395_v10 = vpop.permute.xlu0 %394 }
 0x1bd   :  { %v597_v11 = vpop.f32.mrf.mxu0  ;;  %v546_v54 = vadd.f32 %v1475_v49, %v395_v10 }
 0x1be   :  { %v598_v21 = vadd.f32 %v597_v11, %v440_v2  ;;  %v635_v30 = vmax.f32 %v594_v22, 0.0 }
 0x1bf   :  { %v599_v13 = vpop.f32.mrf.mxu0  ;;  %v619_v22 = vmax.f32 %v546_v54, 0.0 }
 0x1c0   :  { %v600_v18 = vadd.f32 %v599_v13, %v440_v2  ;;  %v636_v28 = vmax.f32 %v598_v21, 0.0  ;;  %v632_v2 = vmax.f32 %v586_v27, 0.0  ;;  %v556_v13 = vadd.f32 %v1481_v52, %v405_v31  ;;  %v385_v53 = vpop.permute.xlu0 %384 }
 0x1c1   :  { %v603_v15 = vpop.f32.mrf.mxu0  ;;  %v620_v21 = vmax.f32 %v550_v55, 0.0  ;;  %v534_v50 = vadd.f32 %v1467_v45, %v385_v53  ;;  %v532_v49 = vadd.f32 %v1465_v44, %v385_v53 }
 0x1c2   :  { %v604_v16 = vadd.f32 %v603_v15, %v445_v63  ;;  %v637_v26 = vmax.f32 %v600_v18, 0.0  ;;  %v624_v15 = vmax.f32 %v562_v61, 0.0  ;;  %v622_v18 = vmax.f32 %v556_v13, 0.0 }
 0x1c3   :  { %v605_v17 = vpop.f32.mrf.mxu0  ;;  %v615_v25 = vmax.f32 %v534_v50, 0.0  ;;  %v614_v27 = vmax.f32 %v532_v49, 0.0 }
 0x1c4   :  { %v606_v19 = vadd.f32 %v605_v17, %v445_v63  ;;  %v638_v24 = vmax.f32 %v604_v16, 0.0  ;;  %v574_v63 = vadd.f32 %v573_v58, %v420_v14  ;;  %v390_v58 = vpop.permute.xlu1 %389  ;;  %v625_v14 = vmax.f32 %v564_v0, 0.0  ;;  %v654_v0 = vld [vmem:[%s1627_s5 + $0x70] sm:$0xff] }
 0x1c5   :  { %v623_v16 = vmax.f32 %v558_v60, 0.0  ;;  %v544_v17 = vadd.f32 %v1473_v48, %v395_v10  ;;  %v540_v52 = vadd.f32 %v1471_v47, %v390_v58  ;;  %v538_v20 = vadd.f32 %v1469_v46, %v390_v58  ;;  %v375_v47 = vpop.permute.xlu0 %374 }
 0x1c6   :  { %v639_v7 = vmax.f32 %v606_v19, 0.0  ;;  %v628_v11 = vmax.f32 %v574_v63, 0.0  ;;  %v621_v19 = vmax.f32 %v552_v56, 0.0  ;;  %v522_v46 = vadd.f32 %v1459_v41, %v375_v47  ;;  %v648_v63 = vld [vmem:[%s1627_s5 + $0x40] sm:$0xff] }
 0x1c7   :  { %v617_v6 = vmax.f32 %v540_v52, 0.0 }
 0x1c8   :  { %752 = vmatprep.subr.mxu1 %v639_v7  ;;  %v380_v51 = vpop.permute.xlu1 %379  ;;  %v618_v7 = vmax.f32 %v544_v17, 0.0 }
 0x1c9   :  { %753 = vmatpush1.msra.mxu1 %v638_v24  ;;  %v528_v48 = vadd.f32 %v1463_v43, %v380_v51  ;;  %v526_v23 = vadd.f32 %v1461_v42, %v380_v51  ;;  %v616_v24 = vmax.f32 %v538_v20, 0.0  ;;  %v611_v42 = vmax.f32 %v522_v46, 0.0  ;;  %v750_v50 = vpop.permute.xlu0 %749 }
 0x1ca   :  { %754 = vmatprep.subr.mxu1 %v637_v26  ;;  %v520_v26 = vadd.f32 %v1457_v40, %v375_v47  ;;  %v640_v40 = vld [vmem:[%s1627_s5] sm:$0xff] }
 0x1cb   :  { %755 = vmatpush1.msra.mxu1 %v636_v28  ;;  %v613_v28 = vmax.f32 %v528_v48, 0.0  ;;  %v612_v29 = vmax.f32 %v526_v23, 0.0 }
 0x1cc   :  { %756 = vmatprep.subr.mxu1 %v635_v30  ;;  %v370_v45 = vpop.permute.xlu1 %369  ;;  %v610_v30 = vmax.f32 %v520_v26, 0.0 }
 0x1cd   :  { %757 = vmatpush1.msra.mxu1 %v634_v33  ;;  %v516_v44 = vadd.f32 %v1455_v39, %v370_v45  ;;  %v514_v43 = vadd.f32 %v1453_v38, %v370_v45  ;;  %v641_v38 = vld [vmem:[%s1627_s5 + $0x8] sm:$0xff]  ;;  %v642_v39 = vld [vmem:[%s1627_s5 + $0x10] sm:$0xff]  ;;  %v644_v33 = vld [vmem:[%s1627_s5 + $0x20] sm:$0xff] }
 0x1ce   :  { %758 = vmatprep.subr.mxu1 %v633_v35  ;;  %v646_v35 = vld [vmem:[%s1627_s5 + $0x30] sm:$0xff] }
 0x1cf   :  { %759 = vmatpush1.msra.mxu1 %v632_v2  ;;  %v609_v41 = vmax.f32 %v516_v44, 0.0  ;;  %v608_v31 = vmax.f32 %v514_v43, 0.0  ;;  %v649_v2 = vld [vmem:[%s1627_s5 + $0x48] sm:$0xff] }
 0x1d0   :  { %760 = vmatprep.subr.mxu1 %v631_v5  ;;  %v651_v5 = vld [vmem:[%s1627_s5 + $0x58] sm:$0xff]  ;;  %v745_v49 = vpop.permute.xlu1 %744 }
 0x1d1   :  { %761 = vmatpush1.msra.mxu1 %v630_v8  ;;  %v653_v8 = vld [vmem:[%s1627_s5 + $0x68] sm:$0xff] }
 0x1d2   :  { %762 = vmatprep.subr.mxu1 %v629_v9  ;;  %v655_v9 = vld [vmem:[%s1627_s5 + $0x78] sm:$0xff] }
 0x1d3   :  { %763 = vmatpush1.msra.mxu1 %v628_v11 }
 0x1d4   :  { %764 = vmatprep.subr.mxu1 %v627_v12  ;;  %v735_v23 = vpop.permute.xlu1 %734 }
 0x1d5   :  { %765 = vmatpush1.msra.mxu1 %v626_v57 }
 0x1d6   :  { %766 = vmatprep.subr.mxu1 %v625_v14 }
 0x1d7   :  { %767 = vmatpush1.msra.mxu1 %v624_v15 }
 0x1d8   :  { %768 = vmatprep.subr.mxu1 %v623_v16  ;;  %v725_v26 = vpop.permute.xlu1 %724 }
 0x1d9   :  { %769 = vmatpush1.msra.mxu1 %v622_v18 }
 0x1da   :  { %770 = vmatprep.subr.mxu1 %v621_v19 }
 0x1db   :  { %771 = vmatpush1.msra.mxu1 %v620_v21 }
 0x1dc   :  { %772 = vmatprep.subr.mxu1 %v619_v22 }
 0x1dd   :  { %773 = vmatpush1.msra.mxu1 %v618_v7 }
 0x1de   :  { %774 = vmatprep.subr.mxu1 %v617_v6  ;;  %v740_v6 = vpop.permute.xlu0 %739 }
 0x1df   :  { %775 = vmatpush1.msra.mxu1 %v616_v24 }
 0x1e0   :  { %776 = vmatprep.subr.mxu1 %v615_v25 }
 0x1e1   :  { %777 = vmatpush1.msra.mxu1 %v614_v27 }
 0x1e2   :  { %778 = vmatprep.subr.mxu1 %v613_v28  ;;  %v730_v25 = vpop.permute.xlu0 %729 }
 0x1e3   :  { %779 = vmatpush1.msra.mxu1 %v612_v29 }
 0x1e4   :  { %780 = vmatprep.subr.mxu1 %v611_v42 }
 0x1e5   :  { %781 = vmatpush1.msra.mxu1 %v610_v30 }
 0x1e6   :  { %782 = vmatprep.subr.mxu1 %v609_v41  ;;  %v720_v42 = vpop.permute.xlu0 %719 }
 0x1e7   :  { %783 = vmatpush1.msra.mxu1 %v608_v31 }
 0x1e8   :  { %817 = vmatmul.mubr.f32.vlgmr.msra.gmra.mxu1 %v640_v40  ;;  %v715_v40 = vpop.permute.xlu1 %714 }
 0x1e9   :  { %822 = vmatprep.mubr.f32.mxu1 %v1093_v36 }
 0x1ec   :  { %823 = vmatmul.mubr.f32.gmra.mxu1 %v641_v38 }
 0x1ed   :  { %828 = vmatprep.mubr.f32.mxu1 %v1093_v36 }
 0x1f0   :  { %829 = vmatmul.mubr.f32.gmra.mxu1 %v642_v39 }
 0x1f1   :  { %834 = vmatprep.mubr.f32.mxu1 %v1093_v36 }
 0x1f4   :  { %835 = vmatmul.mubr.f32.gmra.mxu1 %v643_v32 }
 0x1f5   :  { %840 = vmatprep.mubr.f32.mxu1 %v1093_v36 }
 0x1f8   :  { %841 = vmatmul.mubr.f32.gmra.mxu1 %v644_v33 }
 0x1f9   :  { %846 = vmatprep.mubr.f32.mxu1 %v1093_v36 }
 0x1fc   :  { %847 = vmatmul.mubr.f32.gmra.mxu1 %v645_v34 }
 0x1fd   :  { %852 = vmatprep.mubr.f32.mxu1 %v1093_v36 }
 0x200   :  { %853 = vmatmul.mubr.f32.gmra.mxu1 %v646_v35 }
 0x201   :  { %858 = vmatprep.mubr.f32.mxu1 %v1093_v36 }
 0x204   :  { %859 = vmatmul.mubr.f32.gmra.mxu1 %v647_v37 }
 0x205   :  { %864 = vmatprep.mubr.f32.mxu1 %v1093_v36 }
 0x208   :  { %865 = vmatmul.mubr.f32.gmra.mxu1 %v648_v63 }
 0x209   :  { %870 = vmatprep.mubr.f32.mxu1 %v1093_v36 }
 0x20c   :  { %871 = vmatmul.mubr.f32.gmra.mxu1 %v649_v2  ;;  %v710_v2 = vpop.permute.xlu0 %709 }
 0x20d   :  { %876 = vmatprep.mubr.f32.mxu1 %v1093_v36 }
 0x210   :  { %877 = vmatmul.mubr.f32.gmra.mxu1 %v650_v4 }
 0x211   :  { %882 = vmatprep.mubr.f32.mxu1 %v1093_v36 }
 0x214   :  { %883 = vmatmul.mubr.f32.gmra.mxu1 %v651_v5 }
 0x215   :  { %888 = vmatprep.mubr.f32.mxu1 %v1093_v36 }
 0x218   :  { %889 = vmatmul.mubr.f32.gmra.mxu1 %v652_v3 }
 0x219   :  { %894 = vmatprep.mubr.f32.mxu1 %v1093_v36 }
 0x21c   :  { %895 = vmatmul.mubr.f32.gmra.mxu1 %v653_v8 }
 0x21d   :  { %900 = vmatprep.mubr.f32.mxu1 %v1093_v36 }
 0x220   :  { %901 = vmatmul.mubr.f32.gmra.mxu1 %v654_v0  ;;  %v705_v0 = vpop.permute.xlu1 %704 }
 0x221   :  { %906 = vmatprep.mubr.f32.mxu1 %v1093_v36 }
 0x224   :  { %907 = vmatmul.mubr.f32.gmra.mxu1 %v655_v9 }
 0x2a8   :  { %v1564_v10 = vpop.f32.mrf.mxu1 }
 0x2aa   :  { %v1566_v61 = vpop.f32.mrf.mxu1 }
 0x2ac   :  { %v1568_v11 = vpop.f32.mrf.mxu1 }
 0x2ae   :  { %v1570_v60 = vpop.f32.mrf.mxu1 }
 0x2b0   :  { %v1572_v12 = vpop.f32.mrf.mxu1 }
 0x2b2   :  { %v1574_v58 = vpop.f32.mrf.mxu1 }
 0x2b4   :  { %v1576_v13 = vpop.f32.mrf.mxu1 }
 0x2b6   :  { %v1578_v36 = vpop.f32.mrf.mxu1 }
 0x2b8   :  { %v1580_v57 = vpop.f32.mrf.mxu1 }
 0x2ba   :  { %v1582_v56 = vpop.f32.mrf.mxu1 }
 0x2bc   :  { %v1584_v14 = vpop.f32.mrf.mxu1 }
 0x2be   :  { %v1586_v55 = vpop.f32.mrf.mxu1 }
 0x2c0   :  { %v1588_v15 = vpop.f32.mrf.mxu1 }
 0x2c2   :  { %v1590_v54 = vpop.f32.mrf.mxu1 }
 0x2c4   :  { %v1592_v16 = vpop.f32.mrf.mxu1 }
 0x2c6   :  { %v1594_v53 = vpop.f32.mrf.mxu1 }
 0x2c8   :  { %v866_v17 = vpop.f32.mrf.mxu1 }
 0x2ca   :  { %v868_v18 = vpop.f32.mrf.mxu1 }
 0x2cc   :  { %v872_v52 = vpop.f32.mrf.mxu1 }
 0x2ce   :  { %v874_v19 = vpop.f32.mrf.mxu1 }
 0x2d0   :  { %v878_v51 = vpop.f32.mrf.mxu1 }
 0x2d1   :  { %v879_v9 = vadd.f32 %v878_v51, %v725_v26  ;;  %v695_v51 = vpop.permute.xlu1 %694 }
 0x2d2   :  { %v880_v20 = vpop.f32.mrf.mxu1 }
 0x2d3   :  { %v881_v3 = vadd.f32 %v880_v20, %v725_v26  ;;  %v863_v20 = vadd.f32 %v1594_v53, %v710_v2 }
 0x2d4   :  { %v884_v21 = vpop.f32.mrf.mxu1 }
 0x2d5   :  { %v885_v4 = vadd.f32 %v884_v21, %v730_v25  ;;  %v867_v21 = vadd.f32 %v866_v17, %v715_v40 }
 0x2d6   :  { %v886_v22 = vpop.f32.mrf.mxu1 }
 0x2d7   :  { %v887_v37 = vadd.f32 %v886_v22, %v730_v25  ;;  %v869_v22 = vadd.f32 %v868_v18, %v715_v40  ;;  %v861_v25 = vadd.f32 %v1592_v16, %v710_v2  ;;  %v855_v18 = vadd.f32 %v1588_v15, %v705_v0 }
 0x2d8   :  { %v890_v7 = vpop.f32.mrf.mxu1  ;;  %v929_v26 = vmax.f32 %v867_v21, 0.0  ;;  %v845_v16 = vadd.f32 %v1582_v56, %v695_v51 }
 0x2d9   :  { %v891_v34 = vadd.f32 %v890_v7, %v735_v23  ;;  %v873_v7 = vadd.f32 %v872_v52, %v720_v42  ;;  %v857_v52 = vadd.f32 %v1590_v54, %v705_v0  ;;  %v685_v54 = vpop.permute.xlu1 %684 }
 0x2da   :  { %v892_v48 = vpop.f32.mrf.mxu1  ;;  %v831_v40 = vadd.f32 %v1572_v12, %v685_v54 }
 0x2db   :  { %v893_v32 = vadd.f32 %v892_v48, %v735_v23  ;;  %v936_v48 = vmax.f32 %v887_v37, 0.0  ;;  %v700_v23 = vpop.permute.xlu0 %699 }
 0x2dc   :  { %v896_v47 = vpop.f32.mrf.mxu1  ;;  %v851_v17 = vadd.f32 %v1586_v55, %v700_v23 }
 0x2dd   :  { %v897_v38 = vadd.f32 %v896_v47, %v740_v6  ;;  %v938_v8 = vmax.f32 %v893_v32, 0.0  ;;  %v934_v47 = vmax.f32 %v881_v3, 0.0 }
 0x2de   :  { %v898_v24 = vpop.f32.mrf.mxu1 }
 0x2df   :  { %v899_v41 = vadd.f32 %v898_v24, %v740_v6  ;;  %v939_v5 = vmax.f32 %v897_v38, 0.0  ;;  %v935_v6 = vmax.f32 %v885_v4, 0.0  ;;  %v933_v24 = vmax.f32 %v879_v9, 0.0  ;;  %v690_v53 = vpop.permute.xlu0 %689 }
 0x2e0   :  { %v902_v46 = vpop.f32.mrf.mxu1  ;;  %v839_v15 = vadd.f32 %v1578_v36, %v690_v53  ;;  %v837_v55 = vadd.f32 %v1576_v13, %v690_v53  ;;  %v675_v36 = vpop.permute.xlu1 %674 }
 0x2e1   :  { %v903_v30 = vadd.f32 %v902_v46, %v745_v49  ;;  %v940_v63 = vmax.f32 %v899_v41, 0.0  ;;  %v821_v13 = vadd.f32 %v1566_v61, %v675_v36  ;;  %v1094_v61 = vmov 1966171168  }
 0x2e2   :  { %v904_v45 = vpop.f32.mrf.mxu1  ;;  %v1031_v2 = vunpack.c.l.s4 %v1094_v61 }
 0x2e3   :  { %v905_v43 = vadd.f32 %v904_v45, %v745_v49  ;;  %v941_v35 = vmax.f32 %v903_v30, 0.0  ;;  %v875_v49 = vadd.f32 %v874_v19, %v720_v42  ;;  %v931_v19 = vmax.f32 %v873_v7, 0.0  ;;  %v680_v56 = vpop.permute.xlu0 %679 }
 0x2e4   :  { %v908_v27 = vpop.f32.mrf.mxu1  ;;  %v930_v45 = vmax.f32 %v869_v22, 0.0  ;;  %v925_v42 = vmax.f32 %v855_v18, 0.0  ;;  %v924_v30 = vmax.f32 %v851_v17, 0.0  ;;  %v825_v32 = vadd.f32 %v1568_v11, %v680_v56  ;;  %v945_v11 = vld [vmem:[%s1629_s7] sm:$0x1]  ;;  %s1070_s7 = scalar_lea.vmem %s1057_s30, 32 }
 0x2e5   :  { %v909_v44 = vadd.f32 %v908_v27, %v750_v50  ;;  %v942_v33 = vmax.f32 %v905_v43, 0.0  ;;  %v932_v46 = vmax.f32 %v875_v49, 0.0  ;;  %v928_v27 = vmax.f32 %v863_v20, 0.0  ;;  %p1071_p0 = scmp.ne.s32.totalorder %s1057_s30, %s1070_s7  ;;  %p1076_p2 = scmp.lt.s32.totalorder %s1070_s7, %s1070_s7 }
 0x2e6   :  { %v910_v28 = vpop.f32.mrf.mxu1  ;;  %v926_v43 = vmax.f32 %v857_v52, 0.0  ;;  %v915_v37 = vmax.f32 %v825_v32, 0.0  ;;  %v1032_v4 = vunpack.c.0.s8 %v1031_v2 }
 0x2e7   :  { %v911_v29 = vadd.f32 %v910_v28, %v750_v50  ;;  %v943_v39 = vmax.f32 %v909_v44, 0.0  ;;  %v937_v50 = vmax.f32 %v891_v34, 0.0  ;;  %v849_v44 = vadd.f32 %v1584_v14, %v700_v23  ;;  %p1077_p3 = por %p1076_p2, %p1075_p1 }
 0x2e8   :  { %v927_v28 = vmax.f32 %v861_v25, 0.0  ;;  %v833_v14 = vadd.f32 %v1574_v58, %v685_v54  ;;  %v819_v58 = vadd.f32 %v1564_v10, %v675_v36  ;;  %v950_v10 = vpop.permute.xlu0 %949 }
 0x2e9   :  { %v944_v31 = vmax.f32 %v911_v29, 0.0  ;;  %v843_v29 = vadd.f32 %v1580_v57, %v695_v51  ;;  %v923_v41 = vmax.f32 %v849_v44, 0.0  ;;  %v827_v57 = vadd.f32 %v1570_v60, %v680_v56  ;;  %p1078_p4 = pnand %p1077_p3, %p1071_p0 }
 0x2ea   :  { %v918_v34 = vmax.f32 %v833_v14, 0.0  ;;  %v914_v60 = vmax.f32 %v821_v13, 0.0  ;;  %v955_v3 = vrot.slane %v950_v10, %v135_v1 }
 0x2eb   :  { %956 = vmatprep.subr.mxu0 %v944_v31  ;;  %v922_v31 = vmax.f32 %v845_v16, 0.0  ;;  %v921_v38 = vmax.f32 %v843_v29, 0.0  ;;  %v916_v12 = vmax.f32 %v827_v57, 0.0 }
 0x2ec   :  { %957 = vmatpush1.msra.mxu0 %v943_v39  ;;  %v920_v39 = vmax.f32 %v839_v15, 0.0 }
 0x2ed   :  { %958 = vmatprep.subr.mxu0 %v942_v33  ;;  %v919_v33 = vmax.f32 %v837_v55, 0.0 }
 0x2ee   :  { %959 = vmatpush1.msra.mxu0 %v941_v35  ;;  %v917_v35 = vmax.f32 %v831_v40, 0.0 }
 0x2ef   :  { %960 = vmatprep.subr.mxu0 %v940_v63  ;;  %v913_v63 = vmax.f32 %v819_v58, 0.0 }
 0x2f0   :  { %961 = vmatpush1.msra.mxu0 %v939_v5 }
 0x2f1   :  { %962 = vmatprep.subr.mxu0 %v938_v8 }
 0x2f2   :  { %963 = vmatpush1.msra.mxu0 %v937_v50  ;;  %v1035_v50 = vsub.s32 %v1032_v4, %v1326_v62 }
 0x2f3   :  { %964 = vmatprep.subr.mxu0 %v936_v48 }
 0x2f4   :  { %965 = vmatpush1.msra.mxu0 %v935_v6 }
 0x2f5   :  { %966 = vmatprep.subr.mxu0 %v934_v47 }
 0x2f6   :  { %967 = vmatpush1.msra.mxu0 %v933_v24 }
 0x2f7   :  { %968 = vmatprep.subr.mxu0 %v932_v46 }
 0x2f8   :  { %969 = vmatpush1.msra.mxu0 %v931_v19 }
 0x2f9   :  { %970 = vmatprep.subr.mxu0 %v930_v45 }
 0x2fa   :  { %971 = vmatpush1.msra.mxu0 %v929_v26 }
 0x2fb   :  { %972 = vmatprep.subr.mxu0 %v928_v27 }
 0x2fc   :  { %973 = vmatpush1.msra.mxu0 %v927_v28 }
 0x2fd   :  { %974 = vmatprep.subr.mxu0 %v926_v43 }
 0x2fe   :  { %975 = vmatpush1.msra.mxu0 %v925_v42 }
 0x2ff   :  { %976 = vmatprep.subr.mxu0 %v924_v30 }
 0x300   :  { %977 = vmatpush1.msra.mxu0 %v923_v41 }
 0x301   :  { %978 = vmatprep.subr.mxu0 %v922_v31 }
 0x302   :  { %979 = vmatpush1.msra.mxu0 %v921_v38 }
 0x303   :  { %980 = vmatprep.subr.mxu0 %v920_v39 }
 0x304   :  { %981 = vmatpush1.msra.mxu0 %v919_v33 }
 0x305   :  { %982 = vmatprep.subr.mxu0 %v918_v34 }
 0x306   :  { %983 = vmatpush1.msra.mxu0 %v917_v35 }
 0x307   :  { %984 = vmatprep.subr.mxu0 %v916_v12 }
 0x308   :  { %985 = vmatpush1.msra.mxu0 %v915_v37 }
 0x309   :  { %986 = vmatprep.subr.mxu0 %v914_v60 }
 0x30a   :  { %987 = vmatpush1.msra.mxu0 %v913_v63 }
 0x30b   :  { %1021 = vmatmul.mubr.f32.vlgmr.msra.gmra.mxu0 %v945_v11 }
 0x3cb   :  { %v1022_v5 = vpop.f32.mrf.mxu0 }
 0x3cc   :  { %v1023_v0 = vadd.f32 %v1022_v5, %v955_v3 }
 0x3cd   :  { %v1024_v8 = vpop.f32.mrf.mxu0 }
 0x3ce   :  { %v1025_v9 = vadd.f32 %v1024_v8, %v955_v3 }
 0x3d0   :  { %v1029_v49 = vcombine.low %v1023_v0, %v1025_v9 }
 0x3d2   :  { %v1036_v48 = vrot.slane %v1029_v49, %v1035_v50 }
 0x3d4   :  { %v1043_v7 = vrot.slane %v1036_v48, %v1035_v50 }
 0x3d6   :  { %1049 = vst.msk [vmem:[#allocation3] sm:$0x3] %vm1047_vm0, %v1043_v7 }
 0x3d7   :  { %1081 = shalt.err (!%p1078_p4)
}
 0x3d8   :  { %1059 = dma.vmem_to_hbm [thread:$0]  %s1057_s30, 32, %s1631_s9, [#allocation4]  }
 0x3d9   :  { %1090 = dma.done.wait [#allocation4], 32  }
 0x3da   :  { %1091 = vsyncadd [#allocation4], 4294967264 }
 0x3db   :  { %1063 = vsyncpa [#allocation4], 1 }

</bundles_post_ra>
